<compile_context>
chip_gen: v5e
topology: v5e:2x2
jax: 0.10.0
libtpu: 0.0.40
codegen_flags: <defaults>
</compile_context>

<pallas_src>
import jax
import jax.numpy as jnp
from jax.experimental import pallas as pl
from jax.experimental.pallas import tpu as pltpu


# ----------------------------- Pallas kernel --------------------------------
#
# Packed-param row layout (f32, shape (14, H1), rows zero-padded to H1 lanes):
#   0: b1   1: g1   2: be1
#   3: b2   4: g2   5: be2      (first H2 lanes valid)
#   6: b3   7: g3   8: be3      (first H3 lanes valid)
#   9: b4  10: g4  11: be4      (first H4 lanes valid)
#  12: w5  (first H4 lanes valid)
#  13: b5  (scalar at lane 0)

def _q_critic_kernel(state_ref, action_ref,
                     w1_ref, w2s_ref, w2a_ref, w3_ref, w4_ref,
                     p_ref, q_ref):
    eps = 1e-5  # PyTorch nn.LayerNorm default
    H2 = w2s_ref.shape[1]
    H3 = w3_ref.shape[1]
    H4 = w4_ref.shape[1]

    def ln_relu(x, gamma, beta):
        # Single-pass statistics: the two reduces (sum x, sum x^2) are
        # independent (no centering pass before the variance reduce).
        mu = jnp.mean(x, axis=-1, keepdims=True)
        ms = jnp.mean(x * x, axis=-1, keepdims=True)
        var = ms - mu * mu                      # biased variance, like PyTorch LN
        y = (x - mu) * jax.lax.rsqrt(var + eps) * gamma + beta
        return jnp.maximum(y, 0.0)

    def mm(x, w_ref):
        # bf16 x bf16 on the MXU, f32 accumulation (astype is a no-op for the
        # already-bf16 streamed state/action).
        return jnp.dot(x.astype(jnp.bfloat16), w_ref[...],
                       preferred_element_type=jnp.float32)

    state = state_ref[...]                      # (tb, S)  bf16
    action = action_ref[...]                    # (tb, A)  bf16

    # l1 -> ln1 -> relu
    z1 = mm(state, w1_ref) + p_ref[0:1, :]
    h1 = ln_relu(z1, p_ref[1:2, :], p_ref[2:3, :])

    # cat([h1, action]) @ W2  ==  h1 @ W2[:H1]  +  action @ W2[H1:]
    z2 = mm(h1, w2s_ref) + mm(action, w2a_ref) + p_ref[3:4, :H2]
    h2 = ln_relu(z2, p_ref[4:5, :H2], p_ref[5:6, :H2])

    z3 = mm(h2, w3_ref) + p_ref[6:7, :H3]
    h3 = ln_relu(z3, p_ref[7:8, :H3], p_ref[8:9, :H3])

    z4 = mm(h3, w4_ref) + p_ref[9:10, :H4]
    h4 = ln_relu(z4, p_ref[10:11, :H4], p_ref[11:12, :H4])

    # Final H4 -> 1 projection on the VPU/XLU (avoid an N=1 MXU matmul).
    w5 = p_ref[12:13, :H4]
    b5 = p_ref[13:14, 0:1]
    q_ref[...] = jnp.sum(h4 * w5, axis=-1, keepdims=True) + b5


# ------------------------------ host wrapper ---------------------------------

def _round_up(x, m):
    return ((x + m - 1) // m) * m


def _pick_batch_tile(B, batch_tile, num_tensorcores=1, cap=512):
    """Single tile up to `cap` rows (no forced multi-tile split on 1-TC chips).
    On v7x pass num_tensorcores=2 to split the batch across TensorCores, but
    only when each per-core tile keeps >= 256 rows."""
    if batch_tile is not None:
        assert batch_tile % 8 == 0, "batch_tile must be a multiple of 8 (f32 sublanes)"
        return batch_tile
    B = max(B, 1)
    if num_tensorcores > 1 and B >= 256 * num_tensorcores:
        return min(cap, _round_up(pl.cdiv(B, num_tensorcores), 8))
    return min(cap, _round_up(B, 8))


def q_critic_forward(state, action, params, *, batch_tile=None, num_tensorcores=1):
    B, S = state.shape
    _, A = action.shape
    H1 = params["w1"].shape[1]
    H2 = params["w2s"].shape[1]
    H3 = params["w3"].shape[1]
    H4 = params["w4"].shape[1]
    P_rows = params["packed"].shape[0]
    assert params["w2a"].shape == (A, H2) and params["w1"].shape[0] == S

    # Stream activations in bf16 (the kernel feeds them straight to the MXU).
    state = state.astype(jnp.bfloat16)
    action = action.astype(jnp.bfloat16)

    tb = _pick_batch_tile(B, batch_tile, num_tensorcores)
    Bp = _round_up(B, tb)
    if Bp != B:
        state = jnp.pad(state, ((0, Bp - B), (0, 0)))
        action = jnp.pad(action, ((0, Bp - B), (0, 0)))

    # Weights / packed params are replicated: constant block index -> the
    # pipeline keeps them resident and does not re-DMA per grid step.
    def rep(shape):
        return pl.BlockSpec(shape, lambda i: (0,) * len(shape))

    in_specs = [
        pl.BlockSpec((tb, S), lambda i: (i, 0)),        # state tile
        pl.BlockSpec((tb, A), lambda i: (i, 0)),        # action tile
        rep((S, H1)),                                    # w1
        rep((H1, H2)),                                   # w2 (h1 rows)
        rep((A, H2)),                                    # w2 (action rows)
        rep((H2, H3)),                                   # w3
        rep((H3, H4)),                                   # w4
        rep((P_rows, H1)),                               # packed small params
    ]
    out_spec = pl.BlockSpec((tb, 1), lambda i: (i, 0))

    fn = pl.pallas_call(
        _q_critic_kernel,
        out_shape=jax.ShapeDtypeStruct((Bp, 1), jnp.float32),
        grid_spec=pltpu.PrefetchScalarGridSpec(
            num_scalar_prefetch=0,
            grid=(Bp // tb,),
            in_specs=in_specs,
            out_specs=out_spec,
        ),
        compiler_params=pltpu.CompilerParams(
            # Batch tiles are independent -> megacore-shardable on v7x.
            dimension_semantics=("parallel",),
            # Explicit scoped-VMEM budget so large batch tiles never hit the
            # v5e 16 MiB default; 32 MiB is safe on all generations.
            vmem_limit_bytes=32 * 1024 * 1024,
        ),
    )

    q = fn(state, action,
           params["w1"], params["w2s"], params["w2a"], params["w3"], params["w4"],
           params["packed"])
    return q[:B]


# -------------------------- deterministic init --------------------------------

def init_params(key, state_dim, action_dim, net_width):
    """PyTorch-style default init: Linear weight/bias ~ U(-1/sqrt(fan_in), +),
    LayerNorm gamma=1, beta=0.  Matmul weights stored (in, out) in bfloat16;
    all small per-feature params packed into one (14, H1) f32 array."""
    H1, H2, H3, H4 = net_width, net_width // 2, net_width // 4, net_width // 8

    def linear(key, fan_in, fan_out):
        kw, kb = jax.random.split(key)
        bound = 1.0 / jnp.sqrt(fan_in)
        w = jax.random.uniform(kw, (fan_in, fan_out), jnp.float32, -bound, bound)
        b = jax.random.uniform(kb, (1, fan_out), jnp.float32, -bound, bound)
        return w, b

    keys = jax.random.split(key, 5)
    w1, b1 = linear(keys[0], state_dim, H1)
    w2, b2 = linear(keys[1], H1 + action_dim, H2)
    w3, b3 = linear(keys[2], H2, H3)
    w4, b4 = linear(keys[3], H3, H4)
    w5, b5 = linear(keys[4], H4, 1)

    ones = lambda n: jnp.ones((1, n), jnp.float32)
    zeros = lambda n: jnp.zeros((1, n), jnp.float32)
    g1, be1 = ones(H1), zeros(H1)
    g2, be2 = ones(H2), zeros(H2)
    g3, be3 = ones(H3), zeros(H3)
    g4, be4 = ones(H4), zeros(H4)
    w5r = w5.reshape(1, H4)

    def pad_row(v):
        v = jnp.asarray(v, jnp.float32).reshape(-1)
        return jnp.pad(v, (0, H1 - v.shape[0]))

    packed = jnp.stack([
        pad_row(b1), pad_row(g1), pad_row(be1),
        pad_row(b2), pad_row(g2), pad_row(be2),
        pad_row(b3), pad_row(g3), pad_row(be3),
        pad_row(b4), pad_row(g4), pad_row(be4),
        pad_row(w5r), pad_row(b5),
    ])                                                   # (14, H1) f32

    bf16 = jnp.bfloat16
    return dict(
        # MXU weights, (in, out), bf16.
        w1=w1.astype(bf16),
        w2s=w2[:H1].astype(bf16),
        w2a=w2[H1:].astype(bf16),
        w3=w3.astype(bf16),
        w4=w4.astype(bf16),
        packed=packed,
        # f32 copies kept only for the pure-JAX reference below.
        b1=b1, g1=g1, be1=be1, b2=b2, g2=g2, be2=be2,
        b3=b3, g3=g3, be3=be3, b4=b4, g4=g4, be4=be4,
        w5=w5r, b5=b5,
    )


# --------------------------- pure-JAX reference --------------------------------

def q_critic_ref(state, action, p):
    """Mirrors the kernel numerics (bf16 matmul operands, f32 LN / accumulate)."""
    def ln_relu(x, g, b, eps=1e-5):
        mu = jnp.mean(x, -1, keepdims=True)
        var = jnp.mean((x - mu) ** 2, -1, keepdims=True)
        return jnp.maximum((x - mu) * jax.lax.rsqrt(var + eps) * g + b, 0.0)

    def mm(x, w):
        return jnp.dot(x.astype(jnp.bfloat16), w, preferred_element_type=jnp.float32)

    s = state.astype(jnp.bfloat16)
    a = action.astype(jnp.bfloat16)
    h1 = ln_relu(mm(s, p["w1"]) + p["b1"], p["g1"], p["be1"])
    h2 = ln_relu(mm(h1, p["w2s"]) + mm(a, p["w2a"]) + p["b2"], p["g2"], p["be2"])
    h3 = ln_relu(mm(h2, p["w3"]) + p["b3"], p["g3"], p["be3"])
    h4 = ln_relu(mm(h3, p["w4"]) + p["b4"], p["g4"], p["be4"])
    return jnp.sum(h4 * p["w5"], axis=-1, keepdims=True) + p["b5"]


# ----------------------------------- main --------------------------------------

if __name__ == "__main__":
    key = jax.random.PRNGKey(0)
    k_state, k_action, k_params, k_state2, k_action2 = jax.random.split(key, 5)

    batch, state_dim, action_dim, net_width = 8, 16, 8, 256

    state = jax.random.normal(k_state, (batch, state_dim), jnp.float32)
    action = jax.random.normal(k_action, (batch, action_dim), jnp.float32)
    params = init_params(k_params, state_dim, action_dim, net_width)

    q = jax.block_until_ready(q_critic_forward(state, action, params))
    q_ref = q_critic_ref(state, action, params)
    assert q.shape == (batch, 1)
    assert jnp.allclose(q, q_ref, atol=1e-2, rtol=1e-2), "mismatch vs reference"

    # Non-tile-aligned batch: exercises padding with the default single-tile path.
    batch2 = 40
    state2 = jax.random.normal(k_state2, (batch2, state_dim), jnp.float32)
    action2 = jax.random.normal(k_action2, (batch2, action_dim), jnp.float32)
    q2 = jax.block_until_ready(q_critic_forward(state2, action2, params))
    q2_ref = q_critic_ref(state2, action2, params)
    assert q2.shape == (batch2, 1)
    assert jnp.allclose(q2, q2_ref, atol=1e-2, rtol=1e-2), "mismatch vs reference (padded)"

    # Forced small tile: exercises a multi-step grid with resident replicated weights.
    q3 = jax.block_until_ready(q_critic_forward(state2, action2, params, batch_tile=16))
    assert q3.shape == (batch2, 1)
    assert jnp.allclose(q3, q2_ref, atol=1e-2, rtol=1e-2), "mismatch vs reference (tiled)"

    print("KERNEL_OK")
</pallas_src>

<mosaic_0001>
module attributes {stable_mosaic.version = 11 : i64} {
  func.func @_q_critic_kernel(%arg0: i32, %arg1: memref<8x16xbf16, #tpu.memory_space<vmem>>, %arg2: memref<8x8xbf16, #tpu.memory_space<vmem>>, %arg3: memref<16x256xbf16, #tpu.memory_space<vmem>>, %arg4: memref<256x128xbf16, #tpu.memory_space<vmem>>, %arg5: memref<8x128xbf16, #tpu.memory_space<vmem>>, %arg6: memref<128x64xbf16, #tpu.memory_space<vmem>>, %arg7: memref<64x32xbf16, #tpu.memory_space<vmem>>, %arg8: memref<14x256xf32, #tpu.memory_space<vmem>>, %arg9: memref<8x1xf32, #tpu.memory_space<vmem>>) attributes {dimension_semantics = [#tpu.dimension_semantics<parallel>], iteration_bounds = array<i64: 1>, scalar_prefetch = 0 : i64, scratch_operands = 0 : i64, tpu.core_type = #tpu.core_type<tc>, window_params = [{transform_indices = @transform_0, window_bounds = array<i64: 8, 16>}, {transform_indices = @transform_1, window_bounds = array<i64: 8, 8>}, {pipeline_mode = #tpu.pipeline_mode<synchronous>, transform_indices = @transform_2, window_bounds = array<i64: 16, 256>}, {pipeline_mode = #tpu.pipeline_mode<synchronous>, transform_indices = @transform_3, window_bounds = array<i64: 256, 128>}, {pipeline_mode = #tpu.pipeline_mode<synchronous>, transform_indices = @transform_4, window_bounds = array<i64: 8, 128>}, {pipeline_mode = #tpu.pipeline_mode<synchronous>, transform_indices = @transform_5, window_bounds = array<i64: 128, 64>}, {pipeline_mode = #tpu.pipeline_mode<synchronous>, transform_indices = @transform_6, window_bounds = array<i64: 64, 32>}, {pipeline_mode = #tpu.pipeline_mode<synchronous>, transform_indices = @transform_7, window_bounds = array<i64: 14, 256>}, {transform_indices = @transform_8, window_bounds = array<i64: 8, 1>}]} {
    %c0 = arith.constant 0 : index
    %c0_0 = arith.constant 0 : index
    %0 = vector.load %arg1[%c0, %c0_0] : memref<8x16xbf16, #tpu.memory_space<vmem>>, vector<8x16xbf16>
    %c0_1 = arith.constant 0 : index
    %c0_2 = arith.constant 0 : index
    %1 = vector.load %arg2[%c0_1, %c0_2] : memref<8x8xbf16, #tpu.memory_space<vmem>>, vector<8x8xbf16>
    %c0_3 = arith.constant 0 : index
    %c0_4 = arith.constant 0 : index
    %2 = vector.load %arg3[%c0_3, %c0_4] : memref<16x256xbf16, #tpu.memory_space<vmem>>, vector<16x256xbf16>
    %cst = arith.constant dense<0.000000e+00> : vector<8x256xf32>
    %3 = tpu.matmul %0, %2, %cst {dimension_numbers = #tpu.dot_dimension_numbers<[1], [0], [0], [1], [0, 0, 1, 1], [], []>} : vector<8x16xbf16>, vector<16x256xbf16>, vector<8x256xf32> -> vector<8x256xf32>
    %c0_5 = arith.constant 0 : index
    %c0_6 = arith.constant 0 : index
    %4 = vector.load %arg8[%c0_5, %c0_6] : memref<14x256xf32, #tpu.memory_space<vmem>>, vector<1x256xf32>
    %5 = vector.broadcast %4 : vector<1x256xf32> to vector<8x256xf32>
    %6 = arith.addf %3, %5 : vector<8x256xf32>
    %c1 = arith.constant 1 : index
    %c0_7 = arith.constant 0 : index
    %7 = vector.load %arg8[%c1, %c0_7] : memref<14x256xf32, #tpu.memory_space<vmem>>, vector<1x256xf32>
    %c2 = arith.constant 2 : index
    %c0_8 = arith.constant 0 : index
    %8 = vector.load %arg8[%c2, %c0_8] : memref<14x256xf32, #tpu.memory_space<vmem>>, vector<1x256xf32>
    %cst_9 = arith.constant dense<0.000000e+00> : vector<8xf32>
    %9 = vector.multi_reduction <add>, %6, %cst_9 [1] : vector<8x256xf32> to vector<8xf32>
    %10 = vector.shape_cast %9 : vector<8xf32> to vector<8x1xf32>
    %cst_10 = arith.constant 2.560000e+02 : f32
    %11 = vector.broadcast %cst_10 : f32 to vector<8x1xf32>
    %12 = arith.divf %10, %11 : vector<8x1xf32>
    %13 = arith.mulf %6, %6 : vector<8x256xf32>
    %cst_11 = arith.constant dense<0.000000e+00> : vector<8xf32>
    %14 = vector.multi_reduction <add>, %13, %cst_11 [1] : vector<8x256xf32> to vector<8xf32>
    %15 = vector.shape_cast %14 : vector<8xf32> to vector<8x1xf32>
    %cst_12 = arith.constant 2.560000e+02 : f32
    %16 = vector.broadcast %cst_12 : f32 to vector<8x1xf32>
    %17 = arith.divf %15, %16 : vector<8x1xf32>
    %18 = arith.mulf %12, %12 : vector<8x1xf32>
    %19 = arith.subf %17, %18 : vector<8x1xf32>
    %20 = vector.broadcast %12 : vector<8x1xf32> to vector<8x256xf32>
    %21 = arith.subf %6, %20 : vector<8x256xf32>
    %cst_13 = arith.constant 9.99999974E-6 : f32
    %22 = vector.broadcast %cst_13 : f32 to vector<8x1xf32>
    %23 = arith.addf %19, %22 : vector<8x1xf32>
    %24 = math.rsqrt %23 : vector<8x1xf32>
    %25 = vector.broadcast %24 : vector<8x1xf32> to vector<8x256xf32>
    %26 = arith.mulf %21, %25 : vector<8x256xf32>
    %27 = vector.broadcast %7 : vector<1x256xf32> to vector<8x256xf32>
    %28 = arith.mulf %26, %27 : vector<8x256xf32>
    %29 = vector.broadcast %8 : vector<1x256xf32> to vector<8x256xf32>
    %30 = arith.addf %28, %29 : vector<8x256xf32>
    %cst_14 = arith.constant 0.000000e+00 : f32
    %31 = vector.broadcast %cst_14 : f32 to vector<8x256xf32>
    %32 = arith.maximumf %30, %31 : vector<8x256xf32>
    %33 = arith.truncf %32 : vector<8x256xf32> to vector<8x256xbf16>
    %c0_15 = arith.constant 0 : index
    %c0_16 = arith.constant 0 : index
    %34 = vector.load %arg4[%c0_15, %c0_16] : memref<256x128xbf16, #tpu.memory_space<vmem>>, vector<256x128xbf16>
    %cst_17 = arith.constant dense<0.000000e+00> : vector<8x128xf32>
    %35 = tpu.matmul %33, %34, %cst_17 {dimension_numbers = #tpu.dot_dimension_numbers<[1], [0], [0], [1], [0, 0, 1, 1], [], []>} : vector<8x256xbf16>, vector<256x128xbf16>, vector<8x128xf32> -> vector<8x128xf32>
    %c0_18 = arith.constant 0 : index
    %c0_19 = arith.constant 0 : index
    %36 = vector.load %arg5[%c0_18, %c0_19] : memref<8x128xbf16, #tpu.memory_space<vmem>>, vector<8x128xbf16>
    %cst_20 = arith.constant dense<0.000000e+00> : vector<8x128xf32>
    %37 = tpu.matmul %1, %36, %cst_20 {dimension_numbers = #tpu.dot_dimension_numbers<[1], [0], [0], [1], [0, 0, 1, 1], [], []>} : vector<8x8xbf16>, vector<8x128xbf16>, vector<8x128xf32> -> vector<8x128xf32>
    %38 = arith.addf %35, %37 : vector<8x128xf32>
    %c3 = arith.constant 3 : index
    %c0_21 = arith.constant 0 : index
    %39 = vector.load %arg8[%c3, %c0_21] : memref<14x256xf32, #tpu.memory_space<vmem>>, vector<1x128xf32>
    %40 = vector.broadcast %39 : vector<1x128xf32> to vector<8x128xf32>
    %41 = arith.addf %38, %40 : vector<8x128xf32>
    %c4 = arith.constant 4 : index
    %c0_22 = arith.constant 0 : index
    %42 = vector.load %arg8[%c4, %c0_22] : memref<14x256xf32, #tpu.memory_space<vmem>>, vector<1x128xf32>
    %c5 = arith.constant 5 : index
    %c0_23 = arith.constant 0 : index
    %43 = vector.load %arg8[%c5, %c0_23] : memref<14x256xf32, #tpu.memory_space<vmem>>, vector<1x128xf32>
    %cst_24 = arith.constant dense<0.000000e+00> : vector<8xf32>
    %44 = vector.multi_reduction <add>, %41, %cst_24 [1] : vector<8x128xf32> to vector<8xf32>
    %45 = vector.shape_cast %44 : vector<8xf32> to vector<8x1xf32>
    %cst_25 = arith.constant 1.280000e+02 : f32
    %46 = vector.broadcast %cst_25 : f32 to vector<8x1xf32>
    %47 = arith.divf %45, %46 : vector<8x1xf32>
    %48 = arith.mulf %41, %41 : vector<8x128xf32>
    %cst_26 = arith.constant dense<0.000000e+00> : vector<8xf32>
    %49 = vector.multi_reduction <add>, %48, %cst_26 [1] : vector<8x128xf32> to vector<8xf32>
    %50 = vector.shape_cast %49 : vector<8xf32> to vector<8x1xf32>
    %cst_27 = arith.constant 1.280000e+02 : f32
    %51 = vector.broadcast %cst_27 : f32 to vector<8x1xf32>
    %52 = arith.divf %50, %51 : vector<8x1xf32>
    %53 = arith.mulf %47, %47 : vector<8x1xf32>
    %54 = arith.subf %52, %53 : vector<8x1xf32>
    %55 = vector.broadcast %47 : vector<8x1xf32> to vector<8x128xf32>
    %56 = arith.subf %41, %55 : vector<8x128xf32>
    %cst_28 = arith.constant 9.99999974E-6 : f32
    %57 = vector.broadcast %cst_28 : f32 to vector<8x1xf32>
    %58 = arith.addf %54, %57 : vector<8x1xf32>
    %59 = math.rsqrt %58 : vector<8x1xf32>
    %60 = vector.broadcast %59 : vector<8x1xf32> to vector<8x128xf32>
    %61 = arith.mulf %56, %60 : vector<8x128xf32>
    %62 = vector.broadcast %42 : vector<1x128xf32> to vector<8x128xf32>
    %63 = arith.mulf %61, %62 : vector<8x128xf32>
    %64 = vector.broadcast %43 : vector<1x128xf32> to vector<8x128xf32>
    %65 = arith.addf %63, %64 : vector<8x128xf32>
    %cst_29 = arith.constant 0.000000e+00 : f32
    %66 = vector.broadcast %cst_29 : f32 to vector<8x128xf32>
    %67 = arith.maximumf %65, %66 : vector<8x128xf32>
    %68 = arith.truncf %67 : vector<8x128xf32> to vector<8x128xbf16>
    %c0_30 = arith.constant 0 : index
    %c0_31 = arith.constant 0 : index
    %69 = vector.load %arg6[%c0_30, %c0_31] : memref<128x64xbf16, #tpu.memory_space<vmem>>, vector<128x64xbf16>
    %cst_32 = arith.constant dense<0.000000e+00> : vector<8x64xf32>
    %70 = tpu.matmul %68, %69, %cst_32 {dimension_numbers = #tpu.dot_dimension_numbers<[1], [0], [0], [1], [0, 0, 1, 1], [], []>} : vector<8x128xbf16>, vector<128x64xbf16>, vector<8x64xf32> -> vector<8x64xf32>
    %c6 = arith.constant 6 : index
    %c0_33 = arith.constant 0 : index
    %71 = vector.load %arg8[%c6, %c0_33] : memref<14x256xf32, #tpu.memory_space<vmem>>, vector<1x64xf32>
    %72 = vector.broadcast %71 : vector<1x64xf32> to vector<8x64xf32>
    %73 = arith.addf %70, %72 : vector<8x64xf32>
    %c7 = arith.constant 7 : index
    %c0_34 = arith.constant 0 : index
    %74 = vector.load %arg8[%c7, %c0_34] : memref<14x256xf32, #tpu.memory_space<vmem>>, vector<1x64xf32>
    %c8 = arith.constant 8 : index
    %c0_35 = arith.constant 0 : index
    %75 = vector.load %arg8[%c8, %c0_35] : memref<14x256xf32, #tpu.memory_space<vmem>>, vector<1x64xf32>
    %cst_36 = arith.constant dense<0.000000e+00> : vector<8xf32>
    %76 = vector.multi_reduction <add>, %73, %cst_36 [1] : vector<8x64xf32> to vector<8xf32>
    %77 = vector.shape_cast %76 : vector<8xf32> to vector<8x1xf32>
    %cst_37 = arith.constant 6.400000e+01 : f32
    %78 = vector.broadcast %cst_37 : f32 to vector<8x1xf32>
    %79 = arith.divf %77, %78 : vector<8x1xf32>
    %80 = arith.mulf %73, %73 : vector<8x64xf32>
    %cst_38 = arith.constant dense<0.000000e+00> : vector<8xf32>
    %81 = vector.multi_reduction <add>, %80, %cst_38 [1] : vector<8x64xf32> to vector<8xf32>
    %82 = vector.shape_cast %81 : vector<8xf32> to vector<8x1xf32>
    %cst_39 = arith.constant 6.400000e+01 : f32
    %83 = vector.broadcast %cst_39 : f32 to vector<8x1xf32>
    %84 = arith.divf %82, %83 : vector<8x1xf32>
    %85 = arith.mulf %79, %79 : vector<8x1xf32>
    %86 = arith.subf %84, %85 : vector<8x1xf32>
    %87 = vector.broadcast %79 : vector<8x1xf32> to vector<8x64xf32>
    %88 = arith.subf %73, %87 : vector<8x64xf32>
    %cst_40 = arith.constant 9.99999974E-6 : f32
    %89 = vector.broadcast %cst_40 : f32 to vector<8x1xf32>
    %90 = arith.addf %86, %89 : vector<8x1xf32>
    %91 = math.rsqrt %90 : vector<8x1xf32>
    %92 = vector.broadcast %91 : vector<8x1xf32> to vector<8x64xf32>
    %93 = arith.mulf %88, %92 : vector<8x64xf32>
    %94 = vector.broadcast %74 : vector<1x64xf32> to vector<8x64xf32>
    %95 = arith.mulf %93, %94 : vector<8x64xf32>
    %96 = vector.broadcast %75 : vector<1x64xf32> to vector<8x64xf32>
    %97 = arith.addf %95, %96 : vector<8x64xf32>
    %cst_41 = arith.constant 0.000000e+00 : f32
    %98 = vector.broadcast %cst_41 : f32 to vector<8x64xf32>
    %99 = arith.maximumf %97, %98 : vector<8x64xf32>
    %100 = arith.truncf %99 : vector<8x64xf32> to vector<8x64xbf16>
    %c0_42 = arith.constant 0 : index
    %c0_43 = arith.constant 0 : index
    %101 = vector.load %arg7[%c0_42, %c0_43] : memref<64x32xbf16, #tpu.memory_space<vmem>>, vector<64x32xbf16>
    %cst_44 = arith.constant dense<0.000000e+00> : vector<8x32xf32>
    %102 = tpu.matmul %100, %101, %cst_44 {dimension_numbers = #tpu.dot_dimension_numbers<[1], [0], [0], [1], [0, 0, 1, 1], [], []>} : vector<8x64xbf16>, vector<64x32xbf16>, vector<8x32xf32> -> vector<8x32xf32>
    %c9 = arith.constant 9 : index
    %c0_45 = arith.constant 0 : index
    %103 = vector.load %arg8[%c9, %c0_45] : memref<14x256xf32, #tpu.memory_space<vmem>>, vector<1x32xf32>
    %104 = vector.broadcast %103 : vector<1x32xf32> to vector<8x32xf32>
    %105 = arith.addf %102, %104 : vector<8x32xf32>
    %c10 = arith.constant 10 : index
    %c0_46 = arith.constant 0 : index
    %106 = vector.load %arg8[%c10, %c0_46] : memref<14x256xf32, #tpu.memory_space<vmem>>, vector<1x32xf32>
    %c11 = arith.constant 11 : index
    %c0_47 = arith.constant 0 : index
    %107 = vector.load %arg8[%c11, %c0_47] : memref<14x256xf32, #tpu.memory_space<vmem>>, vector<1x32xf32>
    %cst_48 = arith.constant dense<0.000000e+00> : vector<8xf32>
    %108 = vector.multi_reduction <add>, %105, %cst_48 [1] : vector<8x32xf32> to vector<8xf32>
    %109 = vector.shape_cast %108 : vector<8xf32> to vector<8x1xf32>
    %cst_49 = arith.constant 3.200000e+01 : f32
    %110 = vector.broadcast %cst_49 : f32 to vector<8x1xf32>
    %111 = arith.divf %109, %110 : vector<8x1xf32>
    %112 = arith.mulf %105, %105 : vector<8x32xf32>
    %cst_50 = arith.constant dense<0.000000e+00> : vector<8xf32>
    %113 = vector.multi_reduction <add>, %112, %cst_50 [1] : vector<8x32xf32> to vector<8xf32>
    %114 = vector.shape_cast %113 : vector<8xf32> to vector<8x1xf32>
    %cst_51 = arith.constant 3.200000e+01 : f32
    %115 = vector.broadcast %cst_51 : f32 to vector<8x1xf32>
    %116 = arith.divf %114, %115 : vector<8x1xf32>
    %117 = arith.mulf %111, %111 : vector<8x1xf32>
    %118 = arith.subf %116, %117 : vector<8x1xf32>
    %119 = vector.broadcast %111 : vector<8x1xf32> to vector<8x32xf32>
    %120 = arith.subf %105, %119 : vector<8x32xf32>
    %cst_52 = arith.constant 9.99999974E-6 : f32
    %121 = vector.broadcast %cst_52 : f32 to vector<8x1xf32>
    %122 = arith.addf %118, %121 : vector<8x1xf32>
    %123 = math.rsqrt %122 : vector<8x1xf32>
    %124 = vector.broadcast %123 : vector<8x1xf32> to vector<8x32xf32>
    %125 = arith.mulf %120, %124 : vector<8x32xf32>
    %126 = vector.broadcast %106 : vector<1x32xf32> to vector<8x32xf32>
    %127 = arith.mulf %125, %126 : vector<8x32xf32>
    %128 = vector.broadcast %107 : vector<1x32xf32> to vector<8x32xf32>
    %129 = arith.addf %127, %128 : vector<8x32xf32>
    %cst_53 = arith.constant 0.000000e+00 : f32
    %130 = vector.broadcast %cst_53 : f32 to vector<8x32xf32>
    %131 = arith.maximumf %129, %130 : vector<8x32xf32>
    %c12 = arith.constant 12 : index
    %c0_54 = arith.constant 0 : index
    %132 = vector.load %arg8[%c12, %c0_54] : memref<14x256xf32, #tpu.memory_space<vmem>>, vector<1x32xf32>
    %c13 = arith.constant 13 : index
    %c0_55 = arith.constant 0 : index
    %133 = vector.load %arg8[%c13, %c0_55] : memref<14x256xf32, #tpu.memory_space<vmem>>, vector<1x1xf32>
    %134 = vector.broadcast %132 : vector<1x32xf32> to vector<8x32xf32>
    %135 = arith.mulf %131, %134 : vector<8x32xf32>
    %cst_56 = arith.constant dense<0.000000e+00> : vector<8xf32>
    %136 = vector.multi_reduction <add>, %135, %cst_56 [1] : vector<8x32xf32> to vector<8xf32>
    %137 = vector.shape_cast %136 : vector<8xf32> to vector<8x1xf32>
    %138 = vector.broadcast %133 : vector<1x1xf32> to vector<8x1xf32>
    %139 = arith.addf %137, %138 : vector<8x1xf32>
    %c0_57 = arith.constant 0 : index
    %c0_58 = arith.constant 0 : index
    %140 = vector.load %arg9[%c0_57, %c0_58] : memref<8x1xf32, #tpu.memory_space<vmem>>, vector<8x1xf32>
    tpu.vector_store %arg9[%c0_57, %c0_58], %139 {strides = array<i32>} : memref<8x1xf32, #tpu.memory_space<vmem>>, vector<8x1xf32>,
    return
  }
  func.func @transform_0(%arg0: i32) -> (i32, i32) {
    %c0_i32 = arith.constant 0 : i32
    %c0_i32_0 = arith.constant 0 : i32
    return %arg0, %c0_i32 : i32, i32
  }
  func.func @transform_1(%arg0: i32) -> (i32, i32) {
    %c0_i32 = arith.constant 0 : i32
    %c0_i32_0 = arith.constant 0 : i32
    return %arg0, %c0_i32 : i32, i32
  }
  func.func @transform_2(%arg0: i32) -> (i32, i32) {
    %c0_i32 = arith.constant 0 : i32
    %c0_i32_0 = arith.constant 0 : i32
    %c0_i32_1 = arith.constant 0 : i32
    return %c0_i32, %c0_i32_0 : i32, i32
  }
  func.func @transform_3(%arg0: i32) -> (i32, i32) {
    %c0_i32 = arith.constant 0 : i32
    %c0_i32_0 = arith.constant 0 : i32
    %c0_i32_1 = arith.constant 0 : i32
    return %c0_i32, %c0_i32_0 : i32, i32
  }
  func.func @transform_4(%arg0: i32) -> (i32, i32) {
    %c0_i32 = arith.constant 0 : i32
    %c0_i32_0 = arith.constant 0 : i32
    %c0_i32_1 = arith.constant 0 : i32
    return %c0_i32, %c0_i32_0 : i32, i32
  }
  func.func @transform_5(%arg0: i32) -> (i32, i32) {
    %c0_i32 = arith.constant 0 : i32
    %c0_i32_0 = arith.constant 0 : i32
    %c0_i32_1 = arith.constant 0 : i32
    return %c0_i32, %c0_i32_0 : i32, i32
  }
  func.func @transform_6(%arg0: i32) -> (i32, i32) {
    %c0_i32 = arith.constant 0 : i32
    %c0_i32_0 = arith.constant 0 : i32
    %c0_i32_1 = arith.constant 0 : i32
    return %c0_i32, %c0_i32_0 : i32, i32
  }
  func.func @transform_7(%arg0: i32) -> (i32, i32) {
    %c0_i32 = arith.constant 0 : i32
    %c0_i32_0 = arith.constant 0 : i32
    %c0_i32_1 = arith.constant 0 : i32
    return %c0_i32, %c0_i32_0 : i32, i32
  }
  func.func @transform_8(%arg0: i32) -> (i32, i32) {
    %c0_i32 = arith.constant 0 : i32
    %c0_i32_0 = arith.constant 0 : i32
    return %arg0, %c0_i32 : i32, i32
  }
}

</mosaic_0001>

<bundles_post_ra>
// kernel: tpu_custom_call.1
= control target key start
LH: loop header
LB: loop body
LE: loop exit
PB: predicated region body
PF: predicated region fallthrough
CT: control target
= control target key end

     0   :  { %13 = vsyncpa [#allocation3], 0  ;;  %s786_s30 = smov [#allocation2]   ;;  %s787_s10 = smov 64   ;;  %s961_s0 = inlined_call_operand.vmem [shape: bf16[8,16], index: 0, kind: input, shape index: {}]   ;;  %s962_s1 = inlined_call_operand.vmem [shape: bf16[8,8], index: 1, kind: input, shape index: {}]   ;;  %s963_s2 = inlined_call_operand.vmem [shape: bf16[16,256], index: 2, kind: input, shape index: {}]   ;;  %s964_s3 = inlined_call_operand.hbm [shape: bf16[256,128], index: 3, kind: input, shape index: {}]   ;;  %s965_s4 = inlined_call_operand.vmem [shape: bf16[8,128], index: 4, kind: input, shape index: {}]   ;;  %s966_s5 = inlined_call_operand.vmem [shape: bf16[128,64], index: 5, kind: input, shape index: {}]   ;;  %s967_s6 = inlined_call_operand.vmem [shape: bf16[64,32], index: 6, kind: input, shape index: {}]   ;;  %s968_s7 = inlined_call_operand.vmem [shape: f32[14,256], index: 7, kind: input, shape index: {}]   ;;  %s969_s8 = inlined_call_operand.vmem [shape: f32[8,1], index: 8, kind: output, shape index: {}]  }
   0x1   :  { %s24_s29 = sshll.u32 %s964_s3, 4  ;;  %s26_s9 = sshll.u32 %s786_s30, 4  ;;  %s25_s29 = int_to_ptr.hbm [resolvable:$true] %s24_s29  ;;  %s27_s9 = int_to_ptr.vmem [resolvable:$true] %s26_s9 }
   0x2   :  { %s788_s11 = smov 4  }
   0x3   :  { %32 = dma.hbm_to_vmem [thread:$0]  %s25_s29, 2048, %s27_s9, [#allocation3], %s787_s10, %s787_s10, %s788_s11  }
   0x4   :  { %784 = dma.done.wait [#allocation3], 2048  }
   0x5   :  { %785 = vsyncadd [#allocation3], 4294965248  ;;  %v583_v0 = vld [vmem:[%s963_s2] sm:$0xf]  ;;  %v708_v1 = vld [vmem:[%s963_s2 + $0x4] sm:$0xf0] }
   0x6   :  { %v707_v2 = vld [vmem:[%s963_s2 + $0x4] sm:$0xf]  ;;  %v584_v3 = vor.u32 %v708_v1, %v583_v0  ;;  %v585_v4 = vld [vmem:[%s963_s2 + $0x8] sm:$0xf0]  ;;  %v46_v6 = vld [vmem:[%s961_s0] sm:$0xf] }
   0x7   :  { %v588_v5 = vor.u32 %v707_v2, %v585_v4  ;;  %vm66_vm0 = vcmask 130048   ;;  %v50_v7 = vld [vmem:[%s968_s7] ss:$8 sm:$0x3]  ;;  %v789_v20 = vmov 256.0   ;;  %v716_v21 = vld [vmem:[#allocation2 + $0x38] sm:$0xff] }
   0x8   :  { %77 = vmatpush.bf16.msra.mxu0 %v584_v3  ;;  %v52_v8 = vperm.slane %v50_v7, 0  ;;  %v53_v9 = vperm.slane %v50_v7, 1  ;;  %744 = vrcp.f32 %v789_v20  ;;  %v724_v22 = vld [vmem:[#allocation2 + $0x78] sm:$0xff]  ;;  %302 = vmatpush.bf16.msra.mxu3 %v716_v21  ;;  %v715_v23 = vld [vmem:[#allocation2 + $0x30] sm:$0xff]  ;;  %v714_v27 = vld [vmem:[#allocation2 + $0x28] sm:$0xff]  ;;  %vm189_vm1 = vcmask 1043456  }
   0x9   :  { %90 = vmatpush.bf16.msra.mxu1 %v588_v5  ;;  %v723_v24 = vld [vmem:[#allocation2 + $0x70] sm:$0xff]  ;;  %v722_v28 = vld [vmem:[#allocation2 + $0x68] sm:$0xff]  ;;  %v713_v30 = vld [vmem:[#allocation2 + $0x20] sm:$0xff]  ;;  %vm185_vm2 = vcmask 64512   ;;  %vm445_vm11 = vcmask 523264  }
   0xa   :  { %v721_v31 = vld [vmem:[#allocation2 + $0x60] sm:$0xff]  ;;  %v712_v33 = vld [vmem:[#allocation2 + $0x18] sm:$0xff]  ;;  %v711_v36 = vld [vmem:[#allocation2 + $0x10] sm:$0xff] }
   0xb   :  { %589 = vmatmul.msk.bf16.vlgmr.msra.gmra.mxu0 %vm66_vm0, %v46_v6  ;;  %v720_v34 = vld [vmem:[#allocation2 + $0x58] sm:$0xff]  ;;  %v184_v35 = vld [vmem:[%s965_s4] sm:$0xf]  ;;  %v719_v37 = vld [vmem:[#allocation2 + $0x50] sm:$0xff] }
   0xc   :  { %590 = vmatmul.msk.bf16.vlgmr.msra.gmra.mxu1 %vm66_vm0, %v46_v6  ;;  %315 = vmatpush.bf16.msrb.mxu0 %v724_v22  ;;  %v191_v38 = vsel %vm189_vm1, %v184_v35, 0  ;;  %v47_v40 = vld [vmem:[%s962_s1] sm:$0xf]  ;;  %v710_v42 = vld [vmem:[#allocation2 + $0x8] sm:$0xff]  ;;  %vm532_vm0 = vcmask 261120  }
   0xd   :  { %303 = vmatpush.bf16.msra.mxu3 %v715_v23  ;;  %200 = vmatpush.bf16.msra.mxu2 %v191_v38  ;;  %v718_v43 = vld [vmem:[#allocation2 + $0x48] sm:$0xff]  ;;  %v709_v45 = vld [vmem:[#allocation2] sm:$0xff] }
   0xe   :  { %v745_v25 = vpop.eup %744  ;;  %v717_v46 = vld [vmem:[#allocation2 + $0x40] sm:$0xff]  ;;  %v726_v38 = vld [vmem:[%s966_s5 + $0x8] sm:$0xff] }
   0xf   :  { %v104_v26 = vmul.f32 256.0, %v745_v25  ;;  %vm108_vm3 = vweird.f32 %v745_v25  ;;  %v591_v58 = vld [vmem:[%s968_s7 + $0x1] ss:$8 sm:$0x3]  ;;  %v328_v20 = vld [vmem:[%s968_s7 + $0x3] ss:$0 sm:$0xff] }
  0x10   :  { %316 = vmatpush.bf16.msrb.mxu0 %v723_v24  ;;  %593 = vmatmul.msk.bf16.vlgmr.msra.gmra.mxu2 %vm185_vm2, %v47_v40  ;;  %v592_v59 = vld [vmem:[%s968_s7 + $0x2] ss:$8 sm:$0x3]  ;;  %v135_v63 = vperm.slane %v591_v58, 0  ;;  %v136_v0 = vperm.slane %v591_v58, 1 }
  0x11   :  { %304 = vmatpush.bf16.msra.mxu3 %v714_v27  ;;  %v105_v29 = vsub.f32 1.0, %v104_v26  ;;  %v142_v4 = vperm.slane %v592_v59, 0  ;;  %v143_v5 = vperm.slane %v592_v59, 1  ;;  %v732_v26 = vld [vmem:[%s966_s5 + $0x38] sm:$0xff]  ;;  %v731_v27 = vld [vmem:[%s966_s5 + $0x30] sm:$0xff]  ;;  %v725_v40 = vld [vmem:[%s966_s5] sm:$0xff] }
  0x12   :  { %430 = vmatpush.bf16.msrb.mxu1 %v732_v26 }
  0x13   :  { %v106_v32 = vmul.f32 %v745_v25, %v105_v29 }
  0x14   :  { %317 = vmatpush.bf16.msrb.mxu0 %v722_v28 }
  0x15   :  { %305 = vmatpush.bf16.msra.mxu3 %v713_v30  ;;  %v107_v39 = vadd.f32 %v745_v25, %v106_v32  ;;  %v730_v30 = vld [vmem:[%s966_s5 + $0x28] sm:$0xff]  ;;  %v729_v32 = vld [vmem:[%s966_s5 + $0x20] sm:$0xff] }
  0x16   :  { %431 = vmatpush.bf16.msrb.mxu1 %v731_v27 }
  0x17   :  { %v109_v44 = vsel %vm108_vm3, %v745_v25, %v107_v39  ;;  %v790_v25 = vmov 128.0  }
  0x18   :  { %318 = vmatpush.bf16.msrb.mxu0 %v721_v31 }
  0x19   :  { %306 = vmatpush.bf16.msra.mxu3 %v712_v33 }
  0x1a   :  { %432 = vmatpush.bf16.msrb.mxu1 %v730_v30 }
  0x1c   :  { %319 = vmatpush.bf16.msrb.mxu0 %v720_v34  ;;  %v728_v34 = vld [vmem:[%s966_s5 + $0x18] sm:$0xff] }
  0x1d   :  { %307 = vmatpush.bf16.msra.mxu3 %v711_v36  ;;  %v727_v36 = vld [vmem:[%s966_s5 + $0x10] sm:$0xff] }
  0x1e   :  { %433 = vmatpush.bf16.msrb.mxu1 %v729_v32 }
  0x20   :  { %320 = vmatpush.bf16.msrb.mxu0 %v719_v37 }
  0x21   :  { %308 = vmatpush.bf16.msra.mxu3 %v710_v42 }
  0x22   :  { %434 = vmatpush.bf16.msrb.mxu1 %v728_v34 }
  0x24   :  { %321 = vmatpush.bf16.msrb.mxu0 %v718_v43 }
  0x25   :  { %309 = vmatpush.bf16.msra.mxu3 %v709_v45 }
  0x26   :  { %435 = vmatpush.bf16.msrb.mxu1 %v727_v36 }
  0x28   :  { %322 = vmatpush.bf16.msrb.mxu0 %v717_v46 }
  0x2a   :  { %436 = vmatpush.bf16.msrb.mxu1 %v726_v38  ;;  %v489_v38 = vld [vmem:[%s968_s7 + $0x11] ss:$0 sm:$0xff] }
  0x2e   :  { %437 = vmatpush.bf16.msrb.mxu1 %v725_v40 }
  0x88   :  { %v79_v10 = vpop.f32.mrf.mxu0 }
  0x89   :  { %v859_v11 = vadd.f32 %v79_v10, %v52_v8  ;;  %v92_v12 = vpop.f32.mrf.mxu1 }
  0x8a   :  { %v861_v13 = vadd.f32 %v92_v12, %v53_v9 }
  0x8b   :  { %v111_v16 = vmul.f32 %v859_v11, %v859_v11 }
  0x8c   :  { %v100_v14 = vadd.f32 %v861_v13, %v859_v11  ;;  %v112_v17 = vmul.f32 %v861_v13, %v861_v13 }
  0x8e   :  { %101 = vadd.xlane.f32.xlu0 %v100_v14  ;;  %v113_v19 = vadd.f32 %v112_v17, %v111_v16 }
  0x90   :  { %v81_v15 = vpop.f32.mrf.mxu0 }
  0x91   :  { %v94_v18 = vpop.f32.mrf.mxu1 }
  0x96   :  { %114 = vadd.xlane.f32.xlu0 %v113_v19 }
 0x101   :  { %v102_v41 = vpop.xlane.xlu0 %101 }
 0x102   :  { %v110_v47 = vmul.f32 %v109_v44, %v102_v41 }
 0x104   :  { %v117_v49 = vmul.f32 %v110_v47, %v110_v47  ;;  %v119_v61 = vsub.f32 %v859_v11, %v110_v47  ;;  %v120_v62 = vsub.f32 %v861_v13, %v110_v47  ;;  %v202_v11 = vpop.f32.mrf.mxu2 }
 0x109   :  { %v115_v48 = vpop.xlane.xlu0 %114 }
 0x10a   :  { %v116_v50 = vmul.f32 %v115_v48, %v109_v44 }
 0x10c   :  { %v118_v51 = vsub.f32 %v116_v50, %v117_v49  ;;  %v204_v13 = vpop.f32.mrf.mxu2 }
 0x10e   :  { %v121_v52 = vadd.f32 1e-05, %v118_v51 }
 0x110   :  { %746 = vrsqrt.f32 %v121_v52  ;;  %vm128_vm5 = vweird.f32 %v121_v52 }
 0x111   :  { %748 = vrcp.f32 %v790_v25 }
 0x116   :  { %v747_v53 = vpop.eup %746 }
 0x117   :  { %v123_v54 = vmul.f32 %v747_v53, %v121_v52  ;;  %vm129_vm4 = vweird.f32 %v747_v53  ;;  %v749_v28 = vpop.eup %748 }
 0x118   :  { %vm130_vm6 = vmor %vm128_vm5, %vm129_vm4  ;;  %v335_v29 = vmul.f32 128.0, %v749_v28  ;;  %vm339_vm7 = vweird.f32 %v749_v28  ;;  %vm574_vm5 = vcmask 7168  }
 0x119   :  { %v124_v55 = vmul.f32 %v747_v53, %v123_v54  ;;  %v330_v54 = vld [vmem:[%s968_s7 + $0x4] ss:$0 sm:$0xff] }
 0x11a   :  { %v336_v31 = vsub.f32 1.0, %v335_v29 }
 0x11b   :  { %v125_v56 = vmul.f32 0.5, %v124_v55 }
 0x11c   :  { %v337_v33 = vmul.f32 %v749_v28, %v336_v31  ;;  %v443_v31 = vld [vmem:[%s968_s7 + $0x7] ss:$0 sm:$0xff] }
 0x11d   :  { %v126_v57 = vsub.f32 1.5, %v125_v56 }
 0x11e   :  { %v338_v35 = vadd.f32 %v749_v28, %v337_v33  ;;  %v444_v33 = vld [vmem:[%s968_s7 + $0x10] ss:$0 sm:$0xff] }
 0x11f   :  { %v127_v60 = vmul.f32 %v747_v53, %v126_v57  ;;  %v331_v57 = vld [vmem:[%s968_s7 + $0x5] ss:$0 sm:$0xff] }
 0x120   :  { %v340_v39 = vsel %vm339_vm7, %v749_v28, %v338_v35 }
 0x121   :  { %v131_v1 = vsel %vm130_vm6, %v747_v53, %v127_v60 }
 0x122   :  { %v132_v2 = vmul.f32 %v131_v1, %v119_v61  ;;  %v133_v3 = vmul.f32 %v131_v1, %v120_v62  ;;  %v381_v62 = vld [vmem:[%s968_s7 + $0x6] ss:$0 sm:$0xff] }
 0x124   :  { %v139_v6 = vmul.f32 %v135_v63, %v132_v2  ;;  %v140_v7 = vmul.f32 %v136_v0, %v133_v3 }
 0x126   :  { %v146_v8 = vadd.f32 %v142_v4, %v139_v6  ;;  %v147_v9 = vadd.f32 %v143_v5, %v140_v7  ;;  %v791_v5 = vmov 64.0  }
 0x128   :  { %v148_v10 = vmax.f32 %v146_v8, 0.0  ;;  %v149_v12 = vmax.f32 %v147_v9, 0.0 }
 0x12a   :  { %v150_v14 = vpack.c.bf16 %v148_v10, %v148_v10  ;;  %v151_v15 = vpack.c.bf16 %v149_v12, %v149_v12  ;;  %v736_v10 = vld [vmem:[%s967_s6 + $0x18] sm:$0xff] }
 0x12b   :  { %521 = vmatpush.bf16.msrb.mxu2 %v736_v10 }
 0x12c   :  { %310 = vmatmul.bf16.vlgmr.msra.gmra.mxu3 %v150_v14  ;;  %323 = vmatmul.bf16.vlgmr.msrb.gmra.mxu0 %v151_v15  ;;  %v735_v14 = vld [vmem:[%s967_s6 + $0x10] sm:$0xff] }
 0x12f   :  { %522 = vmatpush.bf16.msrb.mxu2 %v735_v14  ;;  %v568_v14 = vld [vmem:[%s968_s7 + $0x15] ss:$0 sm:$0xff] }
 0x1a9   :  { %v324_v16 = vpop.f32.mrf.mxu0 }
 0x1af   :  { %v311_v17 = vpop.f32.mrf.mxu3 }
 0x1b0   :  { %v312_v18 = vadd.f32 %v311_v17, %v202_v11  ;;  %v734_v11 = vld [vmem:[%s967_s6 + $0x8] sm:$0xff] }
 0x1b1   :  { %v326_v19 = vpop.f32.mrf.mxu0  ;;  %523 = vmatpush.bf16.msrb.mxu2 %v734_v11 }
 0x1b2   :  { %v325_v21 = vadd.f32 %v324_v16, %v312_v18  ;;  %v733_v16 = vld [vmem:[%s967_s6] sm:$0xff] }
 0x1b4   :  { %v329_v22 = vadd.f32 %v328_v20, %v325_v21 }
 0x1b5   :  { %524 = vmatpush.bf16.msrb.mxu2 %v733_v16 }
 0x1b6   :  { %332 = vadd.xlane.f32.xlu1 %v329_v22  ;;  %v342_v24 = vmul.f32 %v329_v22, %v329_v22 }
 0x1b7   :  { %v313_v23 = vpop.f32.mrf.mxu3 }
 0x1be   :  { %343 = vadd.xlane.f32.xlu1 %v342_v24 }
 0x229   :  { %v333_v37 = vpop.xlane.xlu1 %332 }
 0x22a   :  { %v341_v41 = vmul.f32 %v340_v39, %v333_v37 }
 0x22c   :  { %v346_v43 = vmul.f32 %v341_v41, %v341_v41  ;;  %v348_v53 = vsub.f32 %v329_v22, %v341_v41 }
 0x231   :  { %v344_v42 = vpop.xlane.xlu1 %343 }
 0x232   :  { %v345_v44 = vmul.f32 %v344_v42, %v340_v39 }
 0x234   :  { %v347_v45 = vsub.f32 %v345_v44, %v346_v43 }
 0x236   :  { %v349_v46 = vadd.f32 1e-05, %v347_v45  ;;  %v792_v45 = vmov 32.0  }
 0x238   :  { %750 = vrsqrt.f32 %v349_v46  ;;  %vm356_vm9 = vweird.f32 %v349_v46 }
 0x239   :  { %752 = vrcp.f32 %v791_v5  ;;  %v531_v5 = vld [vmem:[%s968_s7 + $0x13] ss:$0 sm:$0xff] }
 0x23e   :  { %v751_v47 = vpop.eup %750 }
 0x23f   :  { %v351_v48 = vmul.f32 %v751_v47, %v349_v46  ;;  %vm357_vm8 = vweird.f32 %v751_v47  ;;  %v753_v6 = vpop.eup %752 }
 0x240   :  { %vm358_vm10 = vmor %vm356_vm9, %vm357_vm8  ;;  %v450_v7 = vmul.f32 64.0, %v753_v6  ;;  %vm454_vm12 = vweird.f32 %v753_v6 }
 0x241   :  { %v352_v49 = vmul.f32 %v751_v47, %v351_v48 }
 0x242   :  { %v451_v8 = vsub.f32 1.0, %v450_v7 }
 0x243   :  { %v353_v50 = vmul.f32 0.5, %v352_v49 }
 0x244   :  { %v452_v9 = vmul.f32 %v753_v6, %v451_v8  ;;  %v567_v8 = vld [vmem:[%s968_s7 + $0x14] ss:$0 sm:$0xff] }
 0x245   :  { %v354_v51 = vsub.f32 1.5, %v353_v50 }
 0x246   :  { %v453_v12 = vadd.f32 %v753_v6, %v452_v9 }
 0x247   :  { %v355_v52 = vmul.f32 %v751_v47, %v354_v51 }
 0x248   :  { %v455_v13 = vsel %vm454_vm12, %v753_v6, %v453_v12 }
 0x249   :  { %v359_v55 = vsel %vm358_vm10, %v751_v47, %v355_v52 }
 0x24a   :  { %v360_v56 = vmul.f32 %v359_v55, %v348_v53 }
 0x24c   :  { %v361_v58 = vmul.f32 %v360_v56, %v330_v54 }
 0x24e   :  { %v362_v59 = vadd.f32 %v361_v58, %v331_v57 }
 0x250   :  { %v363_v60 = vmax.f32 %v362_v59, 0.0 }
 0x252   :  { %v364_v61 = vpack.c.bf16 %v363_v60, %v363_v60 }
 0x254   :  { %438 = vmatmul.bf16.vlgmr.msrb.gmra.mxu1 %v364_v61 }
 0x2d1   :  { %v439_v63 = vpop.f32.mrf.mxu1 }
 0x2d2   :  { %v440_v0 = vadd.f32 %v439_v63, %v381_v62 }
 0x2d4   :  { %v446_v1 = vsel %vm445_vm11, %v440_v0, 0.0  ;;  %v457_v2 = vmul.f32 %v440_v0, %v440_v0 }
 0x2d5   :  { %447 = vadd.xlane.f32.xlu2 %v446_v1 }
 0x2d6   :  { %v458_v4 = vsel %vm445_vm11, %v457_v2, 0.0  ;;  %v530_v2 = vld [vmem:[%s968_s7 + $0x12] ss:$0 sm:$0xff] }
 0x2d9   :  { %v441_v3 = vpop.f32.mrf.mxu1 }
 0x2dd   :  { %459 = vadd.xlane.f32.xlu2 %v458_v4 }
 0x348   :  { %v448_v15 = vpop.xlane.xlu2 %447 }
 0x349   :  { %v456_v17 = vmul.f32 %v455_v13, %v448_v15 }
 0x34b   :  { %v462_v19 = vmul.f32 %v456_v17, %v456_v17  ;;  %v464_v29 = vsub.f32 %v440_v0, %v456_v17 }
 0x350   :  { %v460_v18 = vpop.xlane.xlu2 %459 }
 0x351   :  { %v461_v20 = vmul.f32 %v460_v18, %v455_v13 }
 0x353   :  { %v463_v21 = vsub.f32 %v461_v20, %v462_v19 }
 0x355   :  { %v465_v22 = vadd.f32 1e-05, %v463_v21 }
 0x357   :  { %754 = vrsqrt.f32 %v465_v22  ;;  %vm472_vm14 = vweird.f32 %v465_v22 }
 0x358   :  { %756 = vrcp.f32 %v792_v45 }
 0x35d   :  { %v755_v23 = vpop.eup %754 }
 0x35e   :  { %v467_v24 = vmul.f32 %v755_v23, %v465_v22  ;;  %vm473_vm13 = vweird.f32 %v755_v23  ;;  %v757_v46 = vpop.eup %756 }
 0x35f   :  { %vm474_vm15 = vmor %vm472_vm14, %vm473_vm13  ;;  %v537_v47 = vmul.f32 32.0, %v757_v46  ;;  %vm541_vm1 = vweird.f32 %v757_v46 }
 0x360   :  { %v468_v25 = vmul.f32 %v755_v23, %v467_v24 }
 0x361   :  { %v538_v48 = vsub.f32 1.0, %v537_v47 }
 0x362   :  { %v469_v26 = vmul.f32 0.5, %v468_v25 }
 0x363   :  { %v539_v49 = vmul.f32 %v757_v46, %v538_v48 }
 0x364   :  { %v470_v27 = vsub.f32 1.5, %v469_v26 }
 0x365   :  { %v540_v50 = vadd.f32 %v757_v46, %v539_v49 }
 0x366   :  { %v471_v28 = vmul.f32 %v755_v23, %v470_v27 }
 0x367   :  { %v542_v51 = vsel %vm541_vm1, %v757_v46, %v540_v50 }
 0x368   :  { %v475_v30 = vsel %vm474_vm15, %v755_v23, %v471_v28 }
 0x369   :  { %v476_v32 = vmul.f32 %v475_v30, %v464_v29 }
 0x36b   :  { %v477_v34 = vmul.f32 %v476_v32, %v443_v31 }
 0x36d   :  { %v478_v35 = vadd.f32 %v477_v34, %v444_v33 }
 0x36f   :  { %v479_v36 = vmax.f32 %v478_v35, 0.0 }
 0x371   :  { %v480_v37 = vpack.c.bf16 %v479_v36, %v479_v36 }
 0x373   :  { %706 = vmatmul.msk.bf16.vlgmr.msrb.gmra.mxu2 %vm445_vm11, %v480_v37 }
 0x3f6   :  { %v526_v39 = vpop.f32.mrf.mxu2 }
 0x3f7   :  { %v527_v40 = vadd.f32 %v526_v39, %v489_v38 }
 0x3f9   :  { %v533_v41 = vsel %vm532_vm0, %v527_v40, 0.0  ;;  %v544_v42 = vmul.f32 %v527_v40, %v527_v40 }
 0x3fa   :  { %534 = vadd.xlane.f32.xlu0 %v533_v41 }
 0x3fb   :  { %v545_v43 = vsel %vm532_vm0, %v544_v42, 0.0 }
 0x3fc   :  { %546 = vadd.xlane.f32.xlu1 %v545_v43 }
 0x3fe   :  { %v528_v44 = vpop.f32.mrf.mxu2 }
 0x46d   :  { %v535_v52 = vpop.xlane.xlu0 %534 }
 0x46e   :  { %v543_v53 = vmul.f32 %v542_v51, %v535_v52 }
 0x46f   :  { %v547_v54 = vpop.xlane.xlu1 %546 }
 0x470   :  { %v549_v55 = vmul.f32 %v543_v53, %v543_v53  ;;  %v548_v56 = vmul.f32 %v547_v54, %v542_v51  ;;  %v551_v1 = vsub.f32 %v527_v40, %v543_v53 }
 0x472   :  { %v550_v57 = vsub.f32 %v548_v56, %v549_v55 }
 0x474   :  { %v552_v58 = vadd.f32 1e-05, %v550_v57 }
 0x476   :  { %758 = vrsqrt.f32 %v552_v58  ;;  %vm559_vm3 = vweird.f32 %v552_v58 }
 0x47c   :  { %v759_v59 = vpop.eup %758 }
 0x47d   :  { %v554_v60 = vmul.f32 %v759_v59, %v552_v58  ;;  %vm560_vm2 = vweird.f32 %v759_v59 }
 0x47e   :  { %vm561_vm4 = vmor %vm559_vm3, %vm560_vm2 }
 0x47f   :  { %v555_v61 = vmul.f32 %v759_v59, %v554_v60 }
 0x481   :  { %v556_v62 = vmul.f32 0.5, %v555_v61 }
 0x483   :  { %v557_v63 = vsub.f32 1.5, %v556_v62 }
 0x485   :  { %v558_v0 = vmul.f32 %v759_v59, %v557_v63 }
 0x487   :  { %v562_v3 = vsel %vm561_vm4, %v759_v59, %v558_v0 }
 0x488   :  { %v563_v4 = vmul.f32 %v562_v3, %v551_v1 }
 0x48a   :  { %v564_v6 = vmul.f32 %v563_v4, %v530_v2 }
 0x48c   :  { %v565_v7 = vadd.f32 %v564_v6, %v531_v5 }
 0x48e   :  { %v566_v9 = vmax.f32 %v565_v7, 0.0 }
 0x490   :  { %v569_v10 = vmul.f32 %v567_v8, %v566_v9 }
 0x492   :  { %v570_v12 = vsel %vm532_vm0, %v569_v10, 0.0 }
 0x493   :  { %571 = vadd.xlane.f32.xlu2 %v570_v12 }
 0x506   :  { %v572_v15 = vpop.xlane.xlu2 %571 }
 0x507   :  { %v573_v11 = vadd.f32 %v572_v15, %v568_v14 }
 0x509   :  { %575 = vst.msk [vmem:[%s969_s8] sm:$0xff] %vm574_vm5, %v573_v11 }
 0x50a   :  { %580 = vsyncpa [#allocation3], 1 }

</bundles_post_ra>
